<compile_context>
chip_gen: v7x
topology: tpu7x:2x2x1
jax: 0.10.0
libtpu: 0.0.40
codegen_flags: <defaults>
</compile_context>

<pallas_src>
import jax
import jax.numpy as jnp
from jax.experimental import pallas as pl
from jax.experimental.pallas import tpu as pltpu


_VMEM_LIMIT = 48 * 1024 * 1024   # above the 32 MiB default scoped limit,
                                 # below physical VMEM on v5e/v6e/v7x.


# ---------------------------------------------------------------------------
# kernel 1: fused (normalize + stem conv) as a transposed MXU matmul
#   out[n, :, hw_tile] = relu(W_T @ patches_T[n, :, hw_tile] + b)
#   W_T: (Cf, CK) bf16   patches_T: (CK, THW) bf16   out: (Cf, THW) bf16
# ---------------------------------------------------------------------------
def _stem_kernel(w_ref, p_ref, b_ref, o_ref):
    acc = jnp.dot(w_ref[...], p_ref[...], preferred_element_type=jnp.float32)
    o_ref[...] = jnp.maximum(acc + b_ref[...], 0.0).astype(o_ref.dtype)


def fuse_norm_into_stem(weight, bias, pixel_mean, pixel_std, stride):
    """Fold (x - mean) / std into the stem weight / bias.

    im2col rows are ordered (c, kh, kw), so each input channel owns
    stride*stride consecutive rows of the (CK, Cf) weight.
    """
    reps = stride * stride
    inv_ck = jnp.repeat(1.0 / pixel_std, reps)             # (CK,)
    mean_ck = jnp.repeat(pixel_mean, reps)                  # (CK,)
    w_fused = weight * inv_ck[:, None]                      # (CK, Cf)
    b_fused = bias - (mean_ck * inv_ck) @ weight            # (Cf,)
    return w_fused, b_fused


def backbone_stem(images, weight, bias, pixel_mean, pixel_std, stride=4,
                  lane_tile=16384):
    """images (N, C, H, W) -> features (N, Cf, Hf*Wf) bf16, channel-major.

    Normalization is fused into the weights; the stride x stride conv is
    im2col (one fused XLA transpose+cast pass, see TODO) + one MXU matmul per
    (image, HW tile), written directly in the layout the ROIAlign kernel
    consumes (no transposes afterwards).
    """
    images = images.astype(jnp.float32)
    N, C, H, W = images.shape
    Hf, Wf = H // stride, W // stride
    HW = Hf * Wf
    CK = C * stride * stride
    Cf = weight.shape[1]

    w_fused, b_fused = fuse_norm_into_stem(weight, bias, pixel_mean, pixel_std, stride)
    w_t = w_fused.T.astype(jnp.bfloat16)                    # (Cf, CK)
    b_col = b_fused.reshape(Cf, 1).astype(jnp.float32)      # (Cf, 1)

    # im2col (layout glue, single fused transpose+bf16-cast in XLA):
    # rows ordered (c, kh, kw), lanes ordered (hf, wf) per image.
    p = images.reshape(N, C, Hf, stride, Wf, stride)
    p = p.transpose(0, 1, 3, 5, 2, 4).reshape(N, CK, HW).astype(jnp.bfloat16)

    # [review item 1] large lane tile along the feature-map axis; at demo size
    # the whole HW fits one tile.  (At production, HW should be padded to a
    # multiple of the tile and the tile kept a multiple of 128.)
    thw = HW if HW <= lane_tile else lane_tile
    grid = (N, pl.cdiv(HW, thw))

    out = pl.pallas_call(
        _stem_kernel,
        grid=grid,
        in_specs=[
            pl.BlockSpec((Cf, CK), lambda n, j: (0, 0)),
            pl.BlockSpec((None, CK, thw), lambda n, j: (n, 0, j)),
            pl.BlockSpec((Cf, 1), lambda n, j: (0, 0)),
        ],
        out_specs=pl.BlockSpec((None, Cf, thw), lambda n, j: (n, 0, j)),
        out_shape=jax.ShapeDtypeStruct((N, Cf, HW), jnp.bfloat16),
        compiler_params=pltpu.CompilerParams(
            dimension_semantics=("parallel", "parallel"),
            vmem_limit_bytes=_VMEM_LIMIT),
    )(w_t, p, b_col)
    return out  # (N, Cf, Hf*Wf), spatial row-major (h, w)


# ---------------------------------------------------------------------------
# ROIAlign interpolation-matrix construction (index glue, runs in XLA)
# ---------------------------------------------------------------------------
def _bilinear_1d(v, size):
    # Matches ROIAlign (aligned=True) bilinear_interpolate along one axis.
    valid = (v >= -1.0) & (v <= float(size))
    vc = jnp.clip(v, 0.0, float(size - 1))
    low = jnp.floor(vc)
    low = jnp.minimum(low, float(max(size - 2, 0)))
    frac = vc - low                  # weight for the "high" neighbor
    return low.astype(jnp.int32), 1.0 - frac, frac, valid


def roi_align_weight_matrix_t(boxes, P, sampling_ratio, Hf, Wf, scale):
    """Transposed dense interpolation matrix W_T, shape (R, Hf*Wf, P*P):
       pooled_T[r] (Cf, P*P) = feat_T[b(r)] (Cf, HW) @ W_T[r]."""
    R = boxes.shape[0]
    s = sampling_ratio
    x0 = boxes[:, 0] * scale - 0.5
    y0 = boxes[:, 1] * scale - 0.5
    x1 = boxes[:, 2] * scale - 0.5
    y1 = boxes[:, 3] * scale - 0.5
    bin_w = (x1 - x0) / P
    bin_h = (y1 - y0) / P
    grid = jnp.arange(P, dtype=jnp.float32)
    offs = (jnp.arange(s, dtype=jnp.float32) + 0.5) / s
    # sample coordinates, shape (R, P, s)
    ys = y0[:, None, None] + (grid[None, :, None] + offs[None, None, :]) * bin_h[:, None, None]
    xs = x0[:, None, None] + (grid[None, :, None] + offs[None, None, :]) * bin_w[:, None, None]
    y_low, wy_low, wy_high, y_valid = _bilinear_1d(ys, Hf)
    x_low, wx_low, wx_high, x_valid = _bilinear_1d(xs, Wf)

    def ey(a):  # (R, Ph, sy) -> (R, Ph, Pw, sy, sx)
        return a[:, :, None, :, None]

    def ex(a):  # (R, Pw, sx) -> (R, Ph, Pw, sy, sx)
        return a[:, None, :, None, :]

    valid = (ey(y_valid) & ex(x_valid)).astype(jnp.float32)
    norm = 1.0 / float(s * s)
    corner_idx, corner_w = [], []
    for yi, wy in ((y_low, wy_low), (y_low + 1, wy_high)):
        for xi, wx in ((x_low, wx_low), (x_low + 1, wx_high)):
            corner_idx.append(ey(yi) * Wf + ex(xi))
            corner_w.append(ey(wy) * ex(wx) * valid * norm)
    idx = jnp.stack(corner_idx, axis=-1).reshape(R, P * P, -1)
    w = jnp.stack(corner_w, axis=-1).reshape(R, P * P, -1)
    HW = Hf * Wf
    ridx = jnp.arange(R)[:, None, None]
    pidx = jnp.arange(P * P)[None, :, None]
    # scatter straight into the transposed (R, HW, P*P) layout (f32 accumulate)
    w_t = jnp.zeros((R, HW, P * P), jnp.float32).at[ridx, idx, pidx].add(w)
    return w_t


# ---------------------------------------------------------------------------
# kernel 2: ROIAlign pooling, Rb boxes (same image) per grid step
#   o[g] (Cf, Rb*PPpad) = feats[group_img[g]] (Cf, HW) @ W_T[g] (HW, Rb*PPpad)
# ---------------------------------------------------------------------------
def _roialign_kernel(gimg_ref, w_ref, f_ref, o_ref):
    del gimg_ref  # consumed by the index_maps only
    o_ref[...] = jnp.dot(f_ref[...], w_ref[...],
                         preferred_element_type=jnp.float32).astype(o_ref.dtype)


def group_boxes_by_image(num_instances, boxes_per_step):
    """Static (Python-level) grouping: each grid step handles boxes_per_step
    slots that all belong to one image; short images are padded with dummy
    slots whose outputs are discarded."""
    group_img = []   # image index per group
    slot_box = []    # original box index per slot, -1 for padding
    box_slot = []    # slot index per original box (original box order)
    offset = 0
    for img, n in enumerate(num_instances):
        n_groups = (n + boxes_per_step - 1) // boxes_per_step
        for g in range(n_groups):
            group_img.append(img)
            for j in range(boxes_per_step):
                k = g * boxes_per_step + j
                if k < n:
                    box_slot.append(len(slot_box))
                    slot_box.append(offset + k)
                else:
                    slot_box.append(-1)
        offset += n
    return group_img, slot_box, box_slot


def roi_align_pool(feats, boxes, num_instances, P, sampling_ratio, Hf, Wf,
                   scale, boxes_per_step=8, pp_pad=256):
    """feats (N, Cf, HW) bf16 + per-image gt boxes -> pooled (R, Cf, P, P) f32."""
    N, Cf, HW = feats.shape
    R = boxes.shape[0]
    PP = P * P
    assert PP <= pp_pad and pp_pad % 128 == 0
    Rb = boxes_per_step

    group_img, slot_box, box_slot = group_boxes_by_image(num_instances, Rb)
    G = len(group_img)
    if G == 0:
        return jnp.zeros((0, Cf, P, P), jnp.float32)
    S = G * Rb

    # per-slot boxes (dummy slots get a degenerate zero box; their pooled
    # output is well-defined and discarded by the gather below)
    slot_box_arr = jnp.asarray([max(sb, 0) for sb in slot_box], jnp.int32)
    slot_valid = jnp.asarray([1.0 if sb >= 0 else 0.0 for sb in slot_box], jnp.float32)
    boxes_slots = boxes[slot_box_arr] * slot_valid[:, None]

    # dense transposed interp matrices (S, HW, PP), [item 3] zero-pad PP->pp_pad
    w_t = roi_align_weight_matrix_t(boxes_slots, P, sampling_ratio, Hf, Wf, scale)
    w_t = jnp.pad(w_t, ((0, 0), (0, 0), (0, pp_pad - PP)))
    # [item 4] group layout (G, HW, Rb*pp_pad): columns ordered (slot-in-group, pp)
    w_t = (w_t.reshape(G, Rb, HW, pp_pad)
              .transpose(0, 2, 1, 3)
              .reshape(G, HW, Rb * pp_pad)
              .astype(jnp.bfloat16))

    gimg = jnp.asarray(group_img, jnp.int32)

    out = pl.pallas_call(
        _roialign_kernel,
        grid_spec=pltpu.PrefetchScalarGridSpec(
            num_scalar_prefetch=1,
            grid=(G,),
            in_specs=[
                pl.BlockSpec((None, HW, Rb * pp_pad), lambda g, gi: (g, 0, 0)),
                # [items 5/6] only this group's image is buffered; consecutive
                # groups with the same image index revisit the block (no re-DMA).
                pl.BlockSpec((None, Cf, HW), lambda g, gi: (gi[g], 0, 0)),
            ],
            out_specs=pl.BlockSpec((None, Cf, Rb * pp_pad), lambda g, gi: (g, 0, 0)),
        ),
        out_shape=jax.ShapeDtypeStruct((G, Cf, Rb * pp_pad), jnp.float32),
        compiler_params=pltpu.CompilerParams(
            dimension_semantics=("parallel",),
            vmem_limit_bytes=_VMEM_LIMIT),
    )(gimg, w_t, feats)

    # unpack: (G, Cf, Rb, pp_pad) -> (S, Cf, pp_pad) -> real boxes, first PP cols
    out = (out.reshape(G, Cf, Rb, pp_pad)
              .transpose(0, 2, 1, 3)
              .reshape(S, Cf, pp_pad))
    out = out[jnp.asarray(box_slot, jnp.int32), :, :PP]
    return out.reshape(R, Cf, P, P)


if __name__ == "__main__":
    key = jax.random.PRNGKey(0)
    N, C, H, W = 2, 3, 32, 32        # two images, RGB, 32x32
    STRIDE = 4                       # backbone stem stride ("p2"-like level)
    Cf = 32                          # feature channels
    P = 14                           # cfg.MODEL.ROI_MASK_HEAD.POOLER_RESOLUTION
    SAMPLING = 2                     # cfg.MODEL.ROI_MASK_HEAD.POOLER_SAMPLING_RATIO

    k1, k2 = jax.random.split(key, 2)
    images = jax.random.uniform(k1, (N, C, H, W), jnp.float32, 0.0, 255.0)
    pixel_mean = jnp.array([103.53, 116.28, 123.675], jnp.float32)
    pixel_std = jnp.array([57.375, 57.12, 58.395], jnp.float32)

    # deterministic synthetic stem parameters (stand-in for the backbone)
    stem_w = jax.random.normal(k2, (C * STRIDE * STRIDE, Cf), jnp.float32) * 0.05
    stem_b = jnp.zeros((Cf,), jnp.float32)

    # ground-truth boxes (use_gt_boxes=True path), (x0, y0, x1, y1) image coords
    boxes_img0 = jnp.array([[2.0, 3.0, 20.0, 18.0],
                            [5.0, 5.0, 30.0, 30.0],
                            [0.0, 0.0, 12.0, 31.0]], jnp.float32)
    boxes_img1 = jnp.array([[8.0, 2.0, 28.0, 16.0],
                            [1.0, 10.0, 15.0, 25.0]], jnp.float32)
    num_instances = [boxes_img0.shape[0], boxes_img1.shape[0]]
    boxes = jnp.concatenate([boxes_img0, boxes_img1], axis=0)
    batch_idx = jnp.concatenate(
        [jnp.zeros((num_instances[0],), jnp.int32),
         jnp.ones((num_instances[1],), jnp.int32)]).astype(jnp.int32)

    # ---- forward (FeatSaver inference, single-image dict path) ----
    feats = backbone_stem(images, stem_w, stem_b, pixel_mean, pixel_std,
                          stride=STRIDE)                      # (N, Cf, Hf*Wf)
    Hf, Wf = H // STRIDE, W // STRIDE
    viz_feats = roi_align_pool(feats, boxes, num_instances, P, SAMPLING,
                               Hf, Wf, 1.0 / STRIDE,
                               boxes_per_step=8)              # (R, Cf, P, P)

    # viz_feats.split(num_instances) -> per-image results
    splits = jnp.split(viz_feats, [num_instances[0]], axis=0)
    all_results = [{"feats": v, "proposals": None} for v in splits]

    jax.block_until_ready(viz_feats)
    assert viz_feats.shape == (sum(num_instances), Cf, P, P)
    assert all_results[0]["feats"].shape == (3, Cf, P, P)
    assert all_results[1]["feats"].shape == (2, Cf, P, P)

    # ---- light pure-JAX reference checks (bf16-quantized inputs) ----
    CK, HW = C * STRIDE * STRIDE, Hf * Wf
    p_ref = (images.reshape(N, C, Hf, STRIDE, Wf, STRIDE)
                   .transpose(0, 1, 3, 5, 2, 4).reshape(N, CK, HW))
    w_f, b_f = fuse_norm_into_stem(stem_w, stem_b, pixel_mean, pixel_std, STRIDE)
    feat_ref = jnp.maximum(
        jnp.einsum('kc,nkl->ncl',
                   w_f.astype(jnp.bfloat16).astype(jnp.float32),
                   p_ref.astype(jnp.bfloat16).astype(jnp.float32))
        + b_f[None, :, None], 0.0)
    assert float(jnp.max(jnp.abs(feat_ref - feats.astype(jnp.float32)))) < 0.2

    wt_ref = roi_align_weight_matrix_t(boxes, P, SAMPLING, Hf, Wf, 1.0 / STRIDE)
    wt_ref = wt_ref.astype(jnp.bfloat16).astype(jnp.float32)
    pooled_ref = jnp.einsum('rhp,rch->rcp', wt_ref,
                            feats.astype(jnp.float32)[batch_idx])
    pooled_ref = pooled_ref.reshape(-1, Cf, P, P)
    assert float(jnp.max(jnp.abs(pooled_ref - viz_feats))) < 0.2

    print("KERNEL_OK")
</pallas_src>

<mosaic_0001>
module attributes {stable_mosaic.version = 11 : i64} {
  func.func @_stem_kernel(%arg0: i32, %arg1: i32, %arg2: memref<32x48xbf16, #tpu.memory_space<vmem>>, %arg3: memref<1x48x64xbf16, #tpu.memory_space<vmem>>, %arg4: memref<32x1xf32, #tpu.memory_space<vmem>>, %arg5: memref<1x32x64xbf16, #tpu.memory_space<vmem>>) attributes {dimension_semantics = [#tpu.dimension_semantics<parallel>, #tpu.dimension_semantics<parallel>], iteration_bounds = array<i64: 2, 1>, scalar_prefetch = 0 : i64, scratch_operands = 0 : i64, tpu.core_type = #tpu.core_type<tc>, window_params = [{pipeline_mode = #tpu.pipeline_mode<synchronous>, transform_indices = @transform_0, window_bounds = array<i64: 32, 48>}, {transform_indices = @transform_1, window_bounds = array<i64: 1, 48, 64>}, {pipeline_mode = #tpu.pipeline_mode<synchronous>, transform_indices = @transform_2, window_bounds = array<i64: 32, 1>}, {transform_indices = @transform_3, window_bounds = array<i64: 1, 32, 64>}]} {
    %c0 = arith.constant 0 : index
    %c0_0 = arith.constant 0 : index
    %0 = vector.load %arg2[%c0, %c0_0] : memref<32x48xbf16, #tpu.memory_space<vmem>>, vector<32x48xbf16>
    %c0_1 = arith.constant 0 : index
    %c0_2 = arith.constant 0 : index
    %c0_3 = arith.constant 0 : index
    %1 = vector.load %arg3[%c0_1, %c0_2, %c0_3] : memref<1x48x64xbf16, #tpu.memory_space<vmem>>, vector<1x48x64xbf16>
    %2 = vector.shape_cast %1 : vector<1x48x64xbf16> to vector<48x64xbf16>
    %cst = arith.constant dense<0.000000e+00> : vector<32x64xf32>
    %3 = tpu.matmul %0, %2, %cst {dimension_numbers = #tpu.dot_dimension_numbers<[1], [0], [0], [1], [0, 0, 1, 1], [], []>} : vector<32x48xbf16>, vector<48x64xbf16>, vector<32x64xf32> -> vector<32x64xf32>
    %c0_4 = arith.constant 0 : index
    %c0_5 = arith.constant 0 : index
    %4 = vector.load %arg4[%c0_4, %c0_5] : memref<32x1xf32, #tpu.memory_space<vmem>>, vector<32x1xf32>
    %5 = vector.broadcast %4 : vector<32x1xf32> to vector<32x64xf32>
    %6 = arith.addf %3, %5 : vector<32x64xf32>
    %cst_6 = arith.constant 0.000000e+00 : f32
    %7 = vector.broadcast %cst_6 : f32 to vector<32x64xf32>
    %8 = arith.maximumf %6, %7 : vector<32x64xf32>
    %9 = arith.truncf %8 : vector<32x64xf32> to vector<32x64xbf16>
    %c0_7 = arith.constant 0 : index
    %c0_8 = arith.constant 0 : index
    %c0_9 = arith.constant 0 : index
    %10 = vector.load %arg5[%c0_7, %c0_8, %c0_9] : memref<1x32x64xbf16, #tpu.memory_space<vmem>>, vector<1x32x64xbf16>
    %11 = vector.shape_cast %10 : vector<1x32x64xbf16> to vector<32x64xbf16>
    %12 = vector.shape_cast %9 : vector<32x64xbf16> to vector<1x32x64xbf16>
    tpu.vector_store %arg5[%c0_7, %c0_8, %c0_9], %12 {strides = array<i32>} : memref<1x32x64xbf16, #tpu.memory_space<vmem>>, vector<1x32x64xbf16>,
    return
  }
  func.func @transform_0(%arg0: i32, %arg1: i32) -> (i32, i32) {
    %c0_i32 = arith.constant 0 : i32
    %c0_i32_0 = arith.constant 0 : i32
    %c0_i32_1 = arith.constant 0 : i32
    return %c0_i32, %c0_i32_0 : i32, i32
  }
  func.func @transform_1(%arg0: i32, %arg1: i32) -> (i32, i32, i32) {
    %c0_i32 = arith.constant 0 : i32
    %c0_i32_0 = arith.constant 0 : i32
    return %arg0, %c0_i32, %arg1 : i32, i32, i32
  }
  func.func @transform_2(%arg0: i32, %arg1: i32) -> (i32, i32) {
    %c0_i32 = arith.constant 0 : i32
    %c0_i32_0 = arith.constant 0 : i32
    %c0_i32_1 = arith.constant 0 : i32
    return %c0_i32, %c0_i32_0 : i32, i32
  }
  func.func @transform_3(%arg0: i32, %arg1: i32) -> (i32, i32, i32) {
    %c0_i32 = arith.constant 0 : i32
    %c0_i32_0 = arith.constant 0 : i32
    return %arg0, %c0_i32, %arg1 : i32, i32, i32
  }
}

</mosaic_0001>

<bundles_post_ra>
// kernel: tpu_custom_call.1
= control target key start
LH: loop header
LB: loop body
LE: loop exit
PB: predicated region body
PF: predicated region fallthrough
CT: control target
= control target key end

     0   :  { %8 = vsyncpa [#allocation3], 0  ;;  %s907_s0 = inlined_call_operand.vmem [shape: bf16[32,48], index: 0, kind: input, shape index: {}]   ;;  %s908_s1 = inlined_call_operand.hbm [shape: bf16[2,48,64], index: 1, kind: input, shape index: {}]   ;;  %s909_s2 = inlined_call_operand.vmem [shape: f32[32,1], index: 2, kind: input, shape index: {}]   ;;  %s910_s3 = inlined_call_operand.hbm [shape: bf16[2,32,64], index: 3, kind: output, shape index: {}]  }
   0x1   :  { %10 = vsyncpa [#allocation3 + $0x1], 0 }
   0x2   :  { %11 = vsyncpa [#allocation4], 0 }
   0x3   :  { %13 = vsyncpa [#allocation4 + $0x1], 0  ;;  %s711_s12 = smov 0   ;;  %s713_s13 = smov 0  }
   0x4   :  { %s715_s14 = smov 0   ;;  %s717_s15 = smov 0  }
   0x5   :  { %s719_s16 = smov 0   ;;  %s721_s17 = smov 0  }
   0x6 LB: > { %s450_s18 = sadd.s32 4294967295, %s682_s17   ;;  %s451_s19 = sadd.s32 4294967294, %s682_s17   ;;  %s682_s17 = sphi %s721_s17, %s19_s17   ;;  %s678_s16 = sphi %s719_s16, %s925_s16   ;;  %s674_s15 = sphi %s717_s15, %s924_s15   ;;  %s670_s14 = sphi %s715_s14, %s923_s14   ;;  %s666_s13 = sphi %s713_s13, %s922_s13   ;;  %s662_s12 = sphi %s711_s12, %s921_s12  }
   0x7   : > { %s31_s20 = sadd.s32 1, %s678_s16  ;;  %s61_s21 = sadd.s32 1, %s670_s14 }
   0x8   : > { %p33_p0 = scmp.ge.s32.totalorder %s31_s20, 2  ;;  %p68_p1 = scmp.ne.s32.totalorder %s670_s14, %s666_s13 }
   0x9   : > { %p69_p2 = scmp.eq.s32.totalorder %s682_s17, 0  ;;  %p74_p3 = scmp.ne.s32.totalorder %s666_s13, %s662_s12 }
   0xa   : > { %s927_s20 = smov (%p33_p0, %s31_s20), 0  ;;  %p75_p5 = scmp.eq.s32.totalorder %s450_s18, 0 }
   0xb   : > { %p752_p4 = por %p69_p2, %p68_p1  ;;  %s56_s23 = ssub.s32 %s678_s16, %s927_s20 }
   0xc   : > { %p121_p6 = scmp.eq.s32.totalorder %s450_s18, 1  ;;  %p59_p7 = scmp.eq.s32.totalorder %s56_s23, 0 }
   0xd   : > { %p758_p8 = por %p75_p5, %p74_p3  ;;  %p127_p10 = scmp.eq.s32.totalorder %s451_s19, 1 }
   0xe   : > { %p762_p9 = por %p121_p6, %p68_p1  ;;  %p508_p13 = scmp.lt.s32.totalorder %s682_s17, 2 }
   0xf   : > { %s767_s26 = scalar_select %p59_p7, %s670_s14, %s61_s21  }
  0x10   : > { %s914_s25 = scalar_select %p762_p9, 1, 0 }
  0x11   : > { %p769_p11 = por %p127_p10, %p74_p3  ;;  %s153_s28 = sand.u32 1, %s670_s14  }
  0x12   : > { %s493_s29 = smul.u32 24, %s153_s28  ;;  %p779_p0 = pnand %p508_p13, %p752_p4 }
  0x13   : > { %s915_s27 = scalar_select %p769_p11, 1, 0 }
  0x14   : > { %s494_s30 = smul.u32 384, %s678_s16  ;;  %s157_s8 = scalar_lea.vmem [#allocation2], %s493_s29 }
  0x15   : > { %s165_s9 = sshll.u32 %s157_s8, 4  ;;  %s791_s10 = scalar_lea.sflag [#allocation3], %s153_s28  ;;  %s788_s9 = int_to_ptr.vmem [resolvable:$true] %s165_s9 }
  0x16   : > { %s786_s7 = scalar_lea.hbm %s908_s1, %s494_s30  ;;  %p572_p3 = pneg %p779_p0 }
  0x17   : > { %s570_s11 = scalar_lea.hbm %s786_s7, 384  ;;  %s575_s21 = scalar_lea.hbm %s908_s1, 768 }
  0x18   : > { %p571_p2 = scmp.ne.s32.totalorder %s786_s7, %s570_s11  ;;  %p576_p6 = scmp.lt.u32.totalorder %s786_s7, %s908_s1 }
  0x19   : > { %p577_p7 = scmp.lt.u32.totalorder %s575_s21, %s570_s11  ;;  %p579_p13 = scmp.lt.u32.totalorder %s570_s11, %s786_s7 }
  0x1a   : > { %p573_p4 = pnand %p572_p3, %p571_p2 }
  0x1b   : > { %p578_p10 = por %p577_p7, %p576_p6 }
  0x1c   : > { %p574_p5 = pneg %p573_p4 }
  0x1d   : > { %p580_p12 = por %p579_p13, %p578_p10 }
  0x1f   : > { %p581_p1 = pnand %p580_p12, %p574_p5 }
  0x21   : > { %584 = shalt.err (!%p581_p1)
}
  0x22   : > { %s585_s28 = scalar_lea.vmem %s788_s9, 384  ;;  %s684_s29 = smov [#allocation2]  }
  0x23   : > { %p586_p2 = scmp.ne.s32.totalorder %s788_s9, %s585_s28  ;;  %s590_s30 = sshll.u32 %s684_s29, 4  ;;  %s591_s30 = int_to_ptr.vmem [resolvable:$false] %s590_s30 }
  0x24   : > { %s592_s5 = scalar_lea.vmem %s591_s30, 768  ;;  %p593_p9 = scmp.lt.s32.totalorder %s788_s9, %s591_s30 }
  0x25   : > { %p588_p4 = pnand %p586_p2, %p572_p3  ;;  %p594_p6 = scmp.lt.s32.totalorder %s592_s5, %s585_s28 }
  0x27   : > { %p589_p11 = pneg %p588_p4  ;;  %p595_p7 = por %p594_p6, %p593_p9 }
  0x29   : > { %p596_p10 = pnand %p595_p7, %p589_p11 }
  0x2b   : > { %599 = shalt.err (!%p596_p10)
}
  0x2c   : > { %s685_s6 = smov 64   ;;  %s686_s8 = smov 4  }
  0x2d   : > { %503 = dma.hbm_to_vmem [thread:$0]  (!%p779_p0), %s786_s7, 384, %s788_s9, %s791_s10, %s685_s6, %s685_s6, %s686_s8  }
  0x2e   : > { %p173_p12 = scmp.lt.s32.totalorder %s682_s17, 3  ;;  %p917_p1 = scmp.ge.s32.totalorder %s682_s17, 1 }
  0x30   : > { %p174_p3 = pnand %p917_p1, %p173_p12 }
  0x31   : > { %s823_s11 = sand.u32 (!%p174_p3), 1, %s666_s13  }
  0x32   : > { %177 = sbr.rel (%p174_p3) target bundleno = 308 (0x134), region = 32  ;;  %s180_s19 = scalar_lea.sflag (!%p174_p3), [#allocation3], %s823_s11 }
  0x33   : > { %s495_s18 = smul.u32 (!%p174_p3), 24, %s823_s11 }
  0x35   : > { %s183_s21 = scalar_lea.vmem (!%p174_p3), [#allocation2], %s495_s18 }
  0x39   : > { %653 = dma.done.wait (%p758_p8), %s180_s19, 384  }
  0x3a   : > { %655 = vsyncadd (%p758_p8), %s180_s19, 4294966912  ;;  %v687_v0 = vmov 0   ;;  %v565_v1 = vld [vmem:[%s183_s21] sm:$0xff]   ;;  %v566_v2 = vld [vmem:[%s183_s21 + $0x8] sm:$0xff]   ;;  %vm269_vm0 = vcmask 392192   ;;  %s456_s8 = sshll.u32 %s823_s11, 4 }
  0x3b   : > { %564 = vset.pattern.permute.xlu1 %v687_v0  ;;  %563 = vset.pattern.permute.xlu0 %v687_v0  ;;  %v568_v3 = vld [vmem:[%s907_s0] sm:$0xff]   ;;  %v567_v4 = vld [vmem:[%s183_s21 + $0x10] sm:$0xff]   ;;  %v220_v7 = vld [vmem:[%s909_s2 + $0x18] sm:$0xff]  ;;  %s205_s18 = scalar_lea.vmem [#allocation5], %s456_s8  ;;  %vm345_vm1 = vcmask 519168   ;;  %s477_s21 = sshll.u32 %s674_s15, 8 }
  0x3c   : > { %483 = vmatprep.subr.bf16.mxu0 %v565_v1  ;;  %489 = vmatprep.mubr.msk.bf16.mxu0 %vm269_vm0, %v568_v3  ;;  %v219_v5 = vld [vmem:[%s909_s2 + $0x10] sm:$0xff]  ;;  %v217_v6 = vld [vmem:[%s909_s2] sm:$0xff]  ;;  %v218_v8 = vld [vmem:[%s909_s2 + $0x8] sm:$0xff]  ;;  %s365_s19 = sshll.u32 %s205_s18, 4  ;;  %s858_s9 = scalar_lea.hbm %s910_s3, %s477_s21  ;;  %s853_s19 = int_to_ptr.vmem [resolvable:$true] %s365_s19 }
  0x3d   : > { %484 = vmatpush3.bf16.msra.mxu0 %v565_v1  ;;  %233 = vperm.xlu1 %564, %v219_v5   ;;  %v569_v9 = vld [vmem:[%s907_s0 + $0x8] sm:$0xff]   ;;  %s351_s15 = scalar_lea.sflag [#allocation4], %s823_s11  ;;  %s600_s10 = scalar_lea.vmem %s853_s19, 256 }
  0x3e   : > { %485 = vmatprep.subr.bf16.mxu0 %v566_v2  ;;  %223 = vperm.xlu0 %563, %v217_v6   ;;  %p601_p8 = scmp.ne.s32.totalorder %s853_s19, %s600_s10  ;;  %p918_p9 = scmp.ne.s32.totalorder %s914_s25, 0 }
  0x3f   : > { %s688_s24 = smov [#allocation5]  }
  0x40   : > { %p602_p11 = pnand %p601_p8, %p918_p9  ;;  %s604_s22 = sshll.u32 %s688_s24, 4  ;;  %s605_s22 = int_to_ptr.vmem [resolvable:$false] %s604_s22 }
  0x41   : > { %486 = vmatpush3.bf16.msra.mxu0 %v566_v2  ;;  %238 = vperm.xlu1 %564, %v220_v7   ;;  %s606_s23 = scalar_lea.vmem %s605_s22, 512  ;;  %p607_p5 = scmp.lt.s32.totalorder %s853_s19, %s605_s22 }
  0x42   : > { %487 = vmatprep.subr.bf16.mxu0 %v567_v4  ;;  %228 = vperm.xlu0 %563, %v218_v8   ;;  %p603_p0 = pneg %p602_p11  ;;  %p608_p13 = scmp.lt.s32.totalorder %s606_s23, %s600_s10 }
  0x44   : > { %p609_p2 = por %p608_p13, %p607_p5 }
  0x45   : > { %488 = vmatpush3.bf16.msra.mxu0 %v567_v4 }
  0x46   : > { %p610_p4 = pnand %p609_p2, %p603_p0 }
  0x48   : > { %490 = vmatmul.mubr.msk.bf16.vlgmr.msra.gmra.mrb[0].mxu0 %vm269_vm0, %v569_v9 }
  0xbc   : > { %v234_v10 = vpop.permute.xlu1 %233 }
  0xbd   : > { %v224_v11 = vpop.permute.xlu0 %223 }
  0xc0   : > { %v239_v15 = vpop.permute.xlu1 %238 }
  0xc1   : > { %v229_v18 = vpop.permute.xlu0 %228 }
 0x11b   : > { %v491_v12 = vpop.f32.mrb[0].mxu0 }
 0x11c   : > { %v319_v13 = vadd.f32 %v491_v12, %v234_v10  ;;  %v310_v14 = vpop.f32.mrb[1].mxu0 }
 0x11d   : > { %v311_v16 = vadd.f32 %v310_v14, %v224_v11  ;;  %v492_v17 = vpop.f32.mrb[2].mxu0 }
 0x11e   : > { %v327_v19 = vmax.f32 %v319_v13, 0.0  ;;  %v322_v20 = vadd.f32 %v492_v17, %v239_v15  ;;  %v313_v21 = vpop.f32.mrb[3].mxu0 }
 0x11f   : > { %v325_v22 = vmax.f32 %v311_v16, 0.0  ;;  %v314_v23 = vadd.f32 %v313_v21, %v229_v18 }
 0x120   : > { %v475_v24 = vpack.c.bf16 %v327_v19, %v327_v19  ;;  %v328_v25 = vmax.f32 %v322_v20, 0.0 }
 0x121   : > { %v473_v26 = vpack.c.bf16 %v325_v22, %v325_v22  ;;  %v326_v27 = vmax.f32 %v314_v23, 0.0 }
 0x122   : > { %348 = vst.msk [vmem:[%s205_s18 + $0x8] sm:$0xf] %vm345_vm1, %v475_v24  ;;  %v476_v28 = vpack.c.bf16 %v328_v25, %v328_v25 }
 0x123   : > { %346 = vst.msk [vmem:[%s205_s18] sm:$0xf] %vm345_vm1, %v473_v26  ;;  %v474_v29 = vpack.c.bf16 %v326_v27, %v326_v27 }
 0x124   : > { %349 = vst.msk [vmem:[%s205_s18 + $0xc] sm:$0xf] %vm345_vm1, %v476_v28 }
 0x125   : > { %347 = vst.msk [vmem:[%s205_s18 + $0x4] sm:$0xf] %vm345_vm1, %v474_v29 }
 0x126   : > { %613 = shalt.err (!%p610_p4)
}
 0x127   : > { %s614_s28 = scalar_lea.hbm %s858_s9, 256  ;;  %s618_s5 = scalar_lea.hbm %s910_s3, 512 }
 0x128   : > { %p615_p6 = scmp.ne.s32.totalorder %s858_s9, %s614_s28  ;;  %p619_p12 = scmp.lt.u32.totalorder %s858_s9, %s910_s3 }
 0x129   : > { %p620_p1 = scmp.lt.u32.totalorder %s618_s5, %s614_s28  ;;  %p622_p8 = scmp.lt.u32.totalorder %s614_s28, %s858_s9 }
 0x12a   : > { %p616_p7 = pnand %p615_p6, %p918_p9 }
 0x12b   : > { %p621_p3 = por %p620_p1, %p619_p12 }
 0x12c   : > { %p617_p10 = pneg %p616_p7 }
 0x12d   : > { %p623_p11 = por %p622_p8, %p621_p3 }
 0x12f   : > { %p624_p0 = pnand %p623_p11, %p617_p10 }
 0x131   : > { %627 = shalt.err (!%p624_p0)
}
 0x132   : > { %s689_s18 = smov 64   ;;  %s690_s21 = smov 4  }
 0x133   : > { %498 = dma.vmem_to_hbm [thread:$0]  (%p918_p9), %s853_s19, 256, %s858_s9, %s351_s15, %s689_s18, %s689_s18, %s690_s21  }
 0x134 PF: > { %s380_s4 = sand.u32 1, %s662_s12   ;;  %p919_p5 = scmp.ne.s32.totalorder %s915_s27, 0 }
 0x135   : > { %p920_p13 = scmp.ge.s32.totalorder %s682_s17, 2  ;;  %s381_s7 = scalar_lea.sflag [#allocation4], %s380_s4 }
 0x137   : > { %p505_p2 = pnand %p920_p13, %p919_p5 }
 0x139   : > { %657 = dma.done.wait (!%p505_p2), %s381_s7, 256  }
 0x13a   : > { %659 = vsyncadd (!%p505_p2), %s381_s7, 4294967040  ;;  %s19_s17 = sadd.s32 1, %s682_s17   ;;  %s921_s12 = smov %s666_s13 }
 0x13b   : > { %p16_p4 = scmp.ge.s32.totalorder %s19_s17, 4   ;;  %s922_s13 = smov %s670_s14 }
 0x13c   : > { %s923_s14 = smov %s767_s26  ;;  %s924_s15 = smov %s678_s16 }
 0x13d   : > { %s925_s16 = smov %s927_s20  ;;  %18 = sbr.rel (!%p16_p4) target bundleno = 6 (0x6), region = 77 }
 0x144   :  { %386 = vsyncpa [#allocation3], 1 }
 0x145   :  { %388 = vsyncpa [#allocation3 + $0x1], 1 }
 0x146   :  { %389 = vsyncpa [#allocation4], 1 }
 0x147   :  { %391 = vsyncpa [#allocation4 + $0x1], 1 }

</bundles_post_ra>
